<compile_context>
chip_gen: v7x
topology: tpu7x:2x2x1
jax: 0.10.0
libtpu: 0.0.40
codegen_flags: <defaults>
</compile_context>

<pallas_src>
import jax
import jax.numpy as jnp
from jax.experimental import pallas as pl
from jax.experimental.pallas import tpu as pltpu


def _round_up(a: int, b: int) -> int:
    return ((a + b - 1) // b) * b


def _make_kernel(tm: int, tn: int):
    def kernel(m_ref, x_ref, y_ref, o_ref):
        x = x_ref[...]                        # (tm, 1)  int32 row labels
        y = y_ref[...]                        # (1, tn)  int32 col labels
        m = m_ref[...].astype(jnp.float32)    # (tm, tn) upcast in-register (bf16 ok)
        z = x == y                            # (tm, tn) bool
        signed = jnp.where(z, m, -m)          # positive - negative, per element
        # Fold to a lane-dense (8, 128) partial: cross-vreg VPU adds only,
        # no full cross-lane XLU reduce inside the streaming loop.
        t = jnp.sum(signed.reshape(tm, tn // 128, 128), axis=1)   # (tm, 128)
        t = jnp.sum(t.reshape(tm // 8, 8, 128), axis=0)           # (8, 128)
        o_ref[...] = t

    return kernel


def contrastive_loss(matrix, x, y, margin=0.2):
    nx, ny = matrix.shape
    nelem = nx * ny

    # Tile sizes: lane-dense last dim (multiple of 128, <=2048), 8-aligned rows
    # (<=512).  Worst-case per-buffer matrix tile = 512*2048*4B = 4 MiB.
    tm = min(512, _round_up(nx, 8))
    tn = min(2048, _round_up(ny, 128))
    nx_p = _round_up(nx, tm)
    ny_p = _round_up(ny, tn)
    rb = nx_p // tm
    cb = ny_p // tn

    # Zero-pad the matrix so padded entries contribute nothing to the sum
    # (sign of zero is irrelevant, so padded labels can be anything).
    if (nx_p, ny_p) != (nx, ny):
        matrix = jnp.pad(matrix, ((0, nx_p - nx), (0, ny_p - ny)))
    x2 = jnp.pad(x.astype(jnp.int32), (0, nx_p - nx)).reshape(nx_p, 1)
    y2 = jnp.pad(y.astype(jnp.int32), (0, ny_p - ny)).reshape(1, ny_p)

    partials = pl.pallas_call(
        _make_kernel(tm, tn),
        out_shape=jax.ShapeDtypeStruct((rb, cb, 8, 128), jnp.float32),
        grid=(rb, cb),
        in_specs=[
            pl.BlockSpec((tm, tn), lambda i, j: (i, j)),   # matrix tile (streamed)
            pl.BlockSpec((tm, 1), lambda i, j: (i, 0)),    # row labels for tile
            pl.BlockSpec((1, tn), lambda i, j: (0, j)),    # col labels for tile
        ],
        out_specs=pl.BlockSpec((None, None, 8, 128), lambda i, j: (i, j, 0, 0)),
        compiler_params=pltpu.CompilerParams(
            dimension_semantics=("parallel", "parallel"),
            vmem_limit_bytes=32 * 1024 * 1024,
        ),
    )(matrix, x2, y2)

    # Tiny epilogue in XLA: one cross-lane reduce over (rb*cb, 8, 128) partials.
    return (jnp.sum(partials) + margin) / nelem


def reference_loss(matrix, x, y, margin):
    z = (x[:, None] == y[None, :]).astype(jnp.float32)
    positive = matrix * z
    negative = (1.0 - z) * matrix
    return (jnp.sum(positive) - jnp.sum(negative) + margin) / z.size


if __name__ == "__main__":
    margin = 0.2

    # Case 1: small shape consistent with the module's broadcasting (Nx=8, Ny=16).
    # NOTE: at this size the kernel is pure launch/DMA overhead; it exists to
    # validate semantics — real use is the tiled path exercised in case 2.
    key = jax.random.PRNGKey(0)
    k_mat, k_x, k_y = jax.random.split(key, 3)
    Nx, Ny = 8, 16
    matrix = jax.random.normal(k_mat, (Nx, Ny), dtype=jnp.float32)
    x = jax.random.randint(k_x, (Nx,), 0, 4, dtype=jnp.int32)
    y = jax.random.randint(k_y, (Ny,), 0, 4, dtype=jnp.int32)
    out = jax.block_until_ready(contrastive_loss(matrix, x, y, margin))
    ref = reference_loss(matrix, x, y, margin)
    assert jnp.allclose(out, ref, atol=1e-5, rtol=1e-5), (out, ref)

    # Case 2: non-aligned, multi-tile shape to exercise the grid + padding path.
    k_mat2, k_x2, k_y2 = jax.random.split(jax.random.PRNGKey(1), 3)
    Nx2, Ny2 = 640, 200
    matrix2 = jax.random.normal(k_mat2, (Nx2, Ny2), dtype=jnp.float32)
    x2 = jax.random.randint(k_x2, (Nx2,), 0, 7, dtype=jnp.int32)
    y2 = jax.random.randint(k_y2, (Ny2,), 0, 7, dtype=jnp.int32)
    out2 = jax.block_until_ready(contrastive_loss(matrix2, x2, y2, margin))
    ref2 = reference_loss(matrix2, x2, y2, margin)
    assert jnp.allclose(out2, ref2, atol=1e-4, rtol=1e-4), (out2, ref2)

    print("KERNEL_OK")
</pallas_src>

<mosaic_0001>
module attributes {stable_mosaic.version = 11 : i64} {
  func.func @kernel(%arg0: i32, %arg1: i32, %arg2: memref<8x128xf32, #tpu.memory_space<vmem>>, %arg3: memref<8x1xi32, #tpu.memory_space<vmem>>, %arg4: memref<1x128xi32, #tpu.memory_space<vmem>>, %arg5: memref<1x1x8x128xf32, #tpu.memory_space<vmem>>) attributes {dimension_semantics = [#tpu.dimension_semantics<parallel>, #tpu.dimension_semantics<parallel>], iteration_bounds = array<i64: 1, 1>, scalar_prefetch = 0 : i64, scratch_operands = 0 : i64, tpu.core_type = #tpu.core_type<tc>, window_params = [{transform_indices = @transform_0, window_bounds = array<i64: 8, 128>}, {transform_indices = @transform_1, window_bounds = array<i64: 8, 1>}, {transform_indices = @transform_2, window_bounds = array<i64: 1, 128>}, {transform_indices = @transform_3, window_bounds = array<i64: 1, 1, 8, 128>}]} {
    %c0 = arith.constant 0 : index
    %c0_0 = arith.constant 0 : index
    %0 = vector.load %arg3[%c0, %c0_0] : memref<8x1xi32, #tpu.memory_space<vmem>>, vector<8x1xi32>
    %c0_1 = arith.constant 0 : index
    %c0_2 = arith.constant 0 : index
    %1 = vector.load %arg4[%c0_1, %c0_2] : memref<1x128xi32, #tpu.memory_space<vmem>>, vector<1x128xi32>
    %c0_3 = arith.constant 0 : index
    %c0_4 = arith.constant 0 : index
    %2 = vector.load %arg2[%c0_3, %c0_4] : memref<8x128xf32, #tpu.memory_space<vmem>>, vector<8x128xf32>
    %3 = vector.broadcast %0 : vector<8x1xi32> to vector<8x128xi32>
    %4 = vector.broadcast %1 : vector<1x128xi32> to vector<8x128xi32>
    %5 = arith.cmpi eq, %3, %4 : vector<8x128xi32>
    %cst = arith.constant 0.000000e+00 : f32
    %6 = vector.broadcast %cst : f32 to vector<8x128xf32>
    %7 = arith.subf %6, %2 : vector<8x128xf32>
    %8 = arith.select %5, %2, %7 : vector<8x128xi1>, vector<8x128xf32>
    %9 = vector.shape_cast %8 : vector<8x128xf32> to vector<8x1x128xf32>
    %cst_5 = arith.constant dense<0.000000e+00> : vector<8x128xf32>
    %10 = vector.multi_reduction <add>, %9, %cst_5 [1] : vector<8x1x128xf32> to vector<8x128xf32>
    %11 = vector.shape_cast %10 : vector<8x128xf32> to vector<1x8x128xf32>
    %cst_6 = arith.constant dense<0.000000e+00> : vector<8x128xf32>
    %12 = vector.multi_reduction <add>, %11, %cst_6 [0] : vector<1x8x128xf32> to vector<8x128xf32>
    %c0_7 = arith.constant 0 : index
    %c0_8 = arith.constant 0 : index
    %c0_9 = arith.constant 0 : index
    %c0_10 = arith.constant 0 : index
    %13 = vector.load %arg5[%c0_7, %c0_8, %c0_9, %c0_10] : memref<1x1x8x128xf32, #tpu.memory_space<vmem>>, vector<1x1x8x128xf32>
    %14 = vector.shape_cast %13 : vector<1x1x8x128xf32> to vector<8x128xf32>
    %15 = vector.shape_cast %12 : vector<8x128xf32> to vector<1x1x8x128xf32>
    tpu.vector_store %arg5[%c0_7, %c0_8, %c0_9, %c0_10], %15 {strides = array<i32>} : memref<1x1x8x128xf32, #tpu.memory_space<vmem>>, vector<1x1x8x128xf32>,
    return
  }
  func.func @transform_0(%arg0: i32, %arg1: i32) -> (i32, i32) {
    %c0_i32 = arith.constant 0 : i32
    return %arg0, %arg1 : i32, i32
  }
  func.func @transform_1(%arg0: i32, %arg1: i32) -> (i32, i32) {
    %c0_i32 = arith.constant 0 : i32
    %c0_i32_0 = arith.constant 0 : i32
    return %arg0, %c0_i32 : i32, i32
  }
  func.func @transform_2(%arg0: i32, %arg1: i32) -> (i32, i32) {
    %c0_i32 = arith.constant 0 : i32
    %c0_i32_0 = arith.constant 0 : i32
    return %c0_i32, %arg1 : i32, i32
  }
  func.func @transform_3(%arg0: i32, %arg1: i32) -> (i32, i32, i32, i32) {
    %c0_i32 = arith.constant 0 : i32
    %c0_i32_0 = arith.constant 0 : i32
    %c0_i32_1 = arith.constant 0 : i32
    return %arg0, %arg1, %c0_i32, %c0_i32_0 : i32, i32, i32, i32
  }
}

</mosaic_0001>

<bundles_post_ra>
// kernel: tpu_custom_call.1
= control target key start
LH: loop header
LB: loop body
LE: loop exit
PB: predicated region body
PF: predicated region fallthrough
CT: control target
= control target key end

     0   :  { %s116_s0 = inlined_call_operand.vmem [shape: f32[8,128], index: 0, kind: input, shape index: {}]   ;;  %s117_s1 = inlined_call_operand.vmem [shape: s32[8,1], index: 1, kind: input, shape index: {}]   ;;  %s118_s2 = inlined_call_operand.vmem [shape: s32[1,128], index: 2, kind: input, shape index: {}]   ;;  %s119_s3 = inlined_call_operand.hbm [shape: f32[1,1,8,128], index: 3, kind: output, shape index: {}]  }
   0x1   :  { %v15_v0 = vld [vmem:[%s117_s1] sm:$0xff] }
   0x2   :  { %8 = vsyncpa [#allocation3], 0  ;;  %v73_v1 = vmov 0   ;;  %v17_v2 = vld [vmem:[%s116_s0] sm:$0xff]  ;;  %s74_s18 = smov [#allocation2]  }
   0x3   :  { %48 = vset.pattern.permute.xlu0 %v73_v1  ;;  %v45_v3 = vld [vmem:[%s118_s2] ss:$0 sm:$0xff]  ;;  %v26_v4 = vsub.f32 0.0, %v17_v2  ;;  %s37_s19 = sshll.u32 %s74_s18, 4  ;;  %s38_s19 = int_to_ptr.vmem [resolvable:$true] %s37_s19 }
   0x4   :  { %19 = vperm.xlu0 %48, %v15_v0   ;;  %s49_s1 = scalar_lea.vmem %s38_s19, 128  ;;  %p54_p1 = scmp.lt.s32.totalorder %s38_s19, %s38_s19 }
   0x5   :  { %p50_p0 = scmp.ne.s32.totalorder %s38_s19, %s49_s1  ;;  %p55_p2 = scmp.lt.s32.totalorder %s49_s1, %s49_s1 }
   0x7   :  { %p56_p3 = por %p55_p2, %p54_p1 }
   0x9   :  { %p57_p4 = pnand %p56_p3, %p50_p0 }
  0x83   :  { %v20_v5 = vpop.permute.xlu0 %19 }
  0x84   :  { %vm25_vm0 = vcmp.eq.s32.totalorder %v20_v5, %v45_v3 }
  0x85   :  { %v27_v6 = vsel %vm25_vm0, %v17_v2, %v26_v4 }
  0x86   :  { %30 = vst [vmem:[#allocation2] sm:$0xff] %v27_v6 }
  0x87   :  { %60 = shalt.err (!%p57_p4)
}
  0x88   :  { %s61_s21 = scalar_lea.hbm %s119_s3, 128 }
  0x89   :  { %p62_p5 = scmp.ne.s32.totalorder %s119_s3, %s61_s21  ;;  %p65_p6 = scmp.lt.u32.totalorder %s61_s21, %s119_s3 }
  0x8b   :  { %p67_p7 = pnand %p65_p6, %p62_p5 }
  0x8d   :  { %70 = shalt.err (!%p67_p7)
}
  0x8e   :  { %40 = dma.vmem_to_hbm [thread:$0]  %s38_s19, 128, %s119_s3, [#allocation3]  }
  0x8f   :  { %71 = dma.done.wait [#allocation3], 128  }
  0x90   :  { %72 = vsyncadd [#allocation3], 4294967168 }
  0x91   :  { %44 = vsyncpa [#allocation3], 1 }

</bundles_post_ra>
